<compile_context>
chip_gen: v7x
topology: tpu7x:2x2x1
jax: 0.10.0
libtpu: 0.0.40
codegen_flags: <defaults>
</compile_context>

<pallas_src>
import functools

import jax
import jax.numpy as jnp
from jax.experimental import pallas as pl
from jax.experimental.pallas import tpu as pltpu


def _round_up(x: int, m: int) -> int:
    return ((x + m - 1) // m) * m


def _detect_chip():
    """Return (is_v7x, vmem_capacity_bytes) with safe fallbacks."""
    kind = ""
    try:
        kind = jax.devices()[0].device_kind.lower()
    except Exception:
        pass
    is_v7 = "v7" in kind
    vmem_cap = None
    try:
        vmem_cap = int(pltpu.get_tpu_info().vmem_capacity_bytes)
    except Exception:
        vmem_cap = None
    if vmem_cap is None:
        vmem_cap = 64 * 1024 * 1024 if is_v7 else 128 * 1024 * 1024
    return is_v7, vmem_cap


def _layernorm_kernel(x_ref, alpha_ref, bias_ref, o_ref, *, feature_size, eps):
    # One tile of rows: (TR, D).  Reduce over the last (lane) axis.
    x = x_ref[...].astype(jnp.float32)

    n = float(feature_size)
    mean = jnp.sum(x, axis=-1, keepdims=True) * (1.0 / n)
    centered = x - mean
    # Two-pass unbiased variance (torch.Tensor.std default divides by N-1).
    # Free here (HBM-bound); avoids E[x^2]-mean^2 catastrophic cancellation.
    var = jnp.sum(centered * centered, axis=-1, keepdims=True) * (1.0 / (n - 1.0))
    std = jnp.sqrt(var)

    inv = 1.0 / (std + eps)                                   # (TR, 1), exact
    scale = alpha_ref[...].astype(jnp.float32) * inv          # (TR, D)
    y = centered * scale + bias_ref[...].astype(jnp.float32)
    o_ref[...] = y.astype(o_ref.dtype)


def layer_normalization(x, alpha, bias, *, eps=1e-6):
    """x: (..., D).  alpha, bias: (D,).  Returns same shape/dtype as x."""
    orig_shape = x.shape
    d = orig_shape[-1]
    x2 = x.reshape(-1, d)
    rows = x2.shape[0]

    # Sublane granularity: 8 sublanes for 4-byte dtypes, 16 for packed 2-byte.
    itemsize = jnp.dtype(x.dtype).itemsize
    sub = 8 if itemsize >= 4 else 16

    # Generation-gated VMEM budget.  The in-kernel f32 temporaries (x_f32,
    # centered, y_f32) plus double-buffered in+out total ~7x per_buf, which
    # must stay under scoped VMEM (v7x: 64 MiB physical / 32 MiB scoped per TC).
    is_v7, vmem_cap = _detect_chip()
    if is_v7 or vmem_cap <= 64 * 1024 * 1024:
        per_buf_budget = 2 * 1024 * 1024    # ~14 MiB working set
        vmem_limit = 32 << 20
        num_cores = 2
    else:
        per_buf_budget = 4 * 1024 * 1024    # ~28 MiB working set, 128 MiB phys
        vmem_limit = 64 << 20
        num_cores = 1

    max_rows_by_vmem = max(sub, (per_buf_budget // (d * 4)) // sub * sub)
    rows_ceil = _round_up(rows, sub)

    want_core_split = (num_cores >= 2) and (rows >= 4 * sub)
    if rows_ceil <= max_rows_by_vmem and not want_core_split:
        # Whole input in a single block; a full-extent row dim needs no
        # sublane alignment and has no tail to mask.
        row_tile = rows
    else:
        row_tile = min(max_rows_by_vmem, rows_ceil)
        if want_core_split:
            # Target >=4 blocks (>=2 per v7x TensorCore) so both cores stay
            # busy AND each keeps double-buffered DMA/compute overlap.
            max_tile_for_4 = max(sub, (rows // 4) // sub * sub)
            row_tile = min(row_tile, max_tile_for_4)
        row_tile = max(sub, (row_tile // sub) * sub)

    grid = pl.cdiv(rows, row_tile)

    alpha2 = alpha.reshape(1, d)
    bias2 = bias.reshape(1, d)

    kernel = functools.partial(_layernorm_kernel, feature_size=d, eps=eps)

    out = pl.pallas_call(
        kernel,
        out_shape=jax.ShapeDtypeStruct((rows, d), x.dtype),
        grid_spec=pltpu.PrefetchScalarGridSpec(
            num_scalar_prefetch=0,
            grid=(grid,),
            in_specs=[
                pl.BlockSpec((row_tile, d), lambda i: (i, 0)),
                pl.BlockSpec((1, d), lambda i: (0, 0)),
                pl.BlockSpec((1, d), lambda i: (0, 0)),
            ],
            out_specs=pl.BlockSpec((row_tile, d), lambda i: (i, 0)),
        ),
        compiler_params=pltpu.CompilerParams(
            dimension_semantics=("parallel",),
            vmem_limit_bytes=vmem_limit,
        ),
    )(x2, alpha2, bias2)

    return out.reshape(orig_shape)


def decoder_forward(x, encoder_output, encoder_mask, decoder_mask, *, alpha, bias, eps=1e-6):
    """Decoder.forward: apply layer stack, then final LayerNormalization."""
    # TODO(synk): the nn.ModuleList decoder layers (DecoderBlock) are not
    # defined in this module; the layer loop is an opaque pass-through here.
    for _ in range(0):
        pass
    return layer_normalization(x, alpha, bias, eps=eps)


def _reference(x, alpha, bias, eps=1e-6):
    d = x.shape[-1]
    mean = jnp.mean(x, axis=-1, keepdims=True)
    std = jnp.sqrt(jnp.sum((x - mean) ** 2, axis=-1, keepdims=True) / (d - 1))
    return alpha * (x - mean) / (std + eps) + bias


if __name__ == "__main__":
    # Small shapes consistent with the module's forward:
    # x / encoder_output: (batch, seq, d_model).  d_model chosen as a multiple
    # of 128 so output stores are lane-dense.
    batch, seq, d_model = 2, 8, 128

    key = jax.random.PRNGKey(0)
    kx, ke, kt = jax.random.split(key, 3)
    x = jax.random.normal(kx, (batch, seq, d_model), dtype=jnp.float32)
    encoder_output = jax.random.normal(ke, (batch, seq, d_model), dtype=jnp.float32)
    encoder_mask = jnp.ones((batch, 1, 1, seq), dtype=jnp.float32)
    decoder_mask = jnp.ones((batch, 1, seq, seq), dtype=jnp.float32)

    # LayerNormalization parameters, deterministic init exactly as in __init__:
    # alpha = ones(feature_size), bias = zeros(feature_size).
    alpha = jnp.ones((d_model,), dtype=jnp.float32)
    bias = jnp.zeros((d_model,), dtype=jnp.float32)

    out = decoder_forward(
        x, encoder_output, encoder_mask, decoder_mask, alpha=alpha, bias=bias
    )
    out = jax.block_until_ready(out)
    ref = _reference(x, alpha, bias)
    assert jnp.allclose(out, ref, atol=1e-5, rtol=1e-5), "mismatch vs reference"

    # Re-validate the no-pad / trailing-partial-block path with a row count
    # that is not a multiple of the sublane granularity.
    x_odd = jax.random.normal(kt, (3, 7, d_model), dtype=jnp.float32)
    out_odd = jax.block_until_ready(layer_normalization(x_odd, alpha, bias))
    ref_odd = _reference(x_odd, alpha, bias)
    assert jnp.allclose(out_odd, ref_odd, atol=1e-5, rtol=1e-5), "mismatch (odd rows)"

    print("KERNEL_OK")
</pallas_src>

<mosaic_0001>
module attributes {stable_mosaic.version = 11 : i64} {
  func.func @_layernorm_kernel(%arg0: i32, %arg1: memref<16x128xf32, #tpu.memory_space<vmem>>, %arg2: memref<1x128xf32, #tpu.memory_space<vmem>>, %arg3: memref<1x128xf32, #tpu.memory_space<vmem>>, %arg4: memref<16x128xf32, #tpu.memory_space<vmem>>) attributes {dimension_semantics = [#tpu.dimension_semantics<parallel>], iteration_bounds = array<i64: 1>, scalar_prefetch = 0 : i64, scratch_operands = 0 : i64, tpu.core_type = #tpu.core_type<tc>, window_params = [{transform_indices = @transform_0, window_bounds = array<i64: 16, 128>}, {pipeline_mode = #tpu.pipeline_mode<synchronous>, transform_indices = @transform_1, window_bounds = array<i64: 1, 128>}, {pipeline_mode = #tpu.pipeline_mode<synchronous>, transform_indices = @transform_2, window_bounds = array<i64: 1, 128>}, {transform_indices = @transform_3, window_bounds = array<i64: 16, 128>}]} {
    %c0 = arith.constant 0 : index
    %c0_0 = arith.constant 0 : index
    %0 = vector.load %arg1[%c0, %c0_0] : memref<16x128xf32, #tpu.memory_space<vmem>>, vector<16x128xf32>
    %cst = arith.constant dense<0.000000e+00> : vector<16xf32>
    %1 = vector.multi_reduction <add>, %0, %cst [1] : vector<16x128xf32> to vector<16xf32>
    %2 = vector.shape_cast %1 : vector<16xf32> to vector<16x1xf32>
    %cst_1 = arith.constant 7.812500e-03 : f32
    %3 = vector.broadcast %cst_1 : f32 to vector<16x1xf32>
    %4 = arith.mulf %2, %3 : vector<16x1xf32>
    %5 = vector.broadcast %4 : vector<16x1xf32> to vector<16x128xf32>
    %6 = arith.subf %0, %5 : vector<16x128xf32>
    %7 = arith.mulf %6, %6 : vector<16x128xf32>
    %cst_2 = arith.constant dense<0.000000e+00> : vector<16xf32>
    %8 = vector.multi_reduction <add>, %7, %cst_2 [1] : vector<16x128xf32> to vector<16xf32>
    %9 = vector.shape_cast %8 : vector<16xf32> to vector<16x1xf32>
    %cst_3 = arith.constant 0.00787401571 : f32
    %10 = vector.broadcast %cst_3 : f32 to vector<16x1xf32>
    %11 = arith.mulf %9, %10 : vector<16x1xf32>
    %12 = math.sqrt %11 : vector<16x1xf32>
    %cst_4 = arith.constant 9.99999997E-7 : f32
    %13 = vector.broadcast %cst_4 : f32 to vector<16x1xf32>
    %14 = arith.addf %12, %13 : vector<16x1xf32>
    %cst_5 = arith.constant 1.000000e+00 : f32
    %15 = vector.broadcast %cst_5 : f32 to vector<16x1xf32>
    %16 = arith.divf %15, %14 : vector<16x1xf32>
    %c0_6 = arith.constant 0 : index
    %c0_7 = arith.constant 0 : index
    %17 = vector.load %arg2[%c0_6, %c0_7] : memref<1x128xf32, #tpu.memory_space<vmem>>, vector<1x128xf32>
    %18 = vector.broadcast %17 : vector<1x128xf32> to vector<16x128xf32>
    %19 = vector.broadcast %16 : vector<16x1xf32> to vector<16x128xf32>
    %20 = arith.mulf %18, %19 : vector<16x128xf32>
    %21 = arith.mulf %6, %20 : vector<16x128xf32>
    %c0_8 = arith.constant 0 : index
    %c0_9 = arith.constant 0 : index
    %22 = vector.load %arg3[%c0_8, %c0_9] : memref<1x128xf32, #tpu.memory_space<vmem>>, vector<1x128xf32>
    %23 = vector.broadcast %22 : vector<1x128xf32> to vector<16x128xf32>
    %24 = arith.addf %21, %23 : vector<16x128xf32>
    %c0_10 = arith.constant 0 : index
    %c0_11 = arith.constant 0 : index
    %25 = vector.load %arg4[%c0_10, %c0_11] : memref<16x128xf32, #tpu.memory_space<vmem>>, vector<16x128xf32>
    tpu.vector_store %arg4[%c0_10, %c0_11], %24 {strides = array<i32>} : memref<16x128xf32, #tpu.memory_space<vmem>>, vector<16x128xf32>,
    return
  }
  func.func @transform_0(%arg0: i32) -> (i32, i32) {
    %c0_i32 = arith.constant 0 : i32
    %c0_i32_0 = arith.constant 0 : i32
    return %arg0, %c0_i32 : i32, i32
  }
  func.func @transform_1(%arg0: i32) -> (i32, i32) {
    %c0_i32 = arith.constant 0 : i32
    %c0_i32_0 = arith.constant 0 : i32
    %c0_i32_1 = arith.constant 0 : i32
    return %c0_i32, %c0_i32_0 : i32, i32
  }
  func.func @transform_2(%arg0: i32) -> (i32, i32) {
    %c0_i32 = arith.constant 0 : i32
    %c0_i32_0 = arith.constant 0 : i32
    %c0_i32_1 = arith.constant 0 : i32
    return %c0_i32, %c0_i32_0 : i32, i32
  }
  func.func @transform_3(%arg0: i32) -> (i32, i32) {
    %c0_i32 = arith.constant 0 : i32
    %c0_i32_0 = arith.constant 0 : i32
    return %arg0, %c0_i32 : i32, i32
  }
}

</mosaic_0001>

<bundles_post_ra>
// kernel: tpu_custom_call.1
= control target key start
LH: loop header
LB: loop body
LE: loop exit
PB: predicated region body
PF: predicated region fallthrough
CT: control target
= control target key end

     0   :  { %8 = vsyncpa [#allocation3], 0  ;;  %s327_s0 = inlined_call_operand.hbm [shape: f32[16,128], index: 0, kind: input, shape index: {}]   ;;  %s328_s1 = inlined_call_operand.hbm [shape: f32[1,128], index: 1, kind: input, shape index: {}]   ;;  %s329_s2 = inlined_call_operand.hbm [shape: f32[1,128], index: 2, kind: input, shape index: {}]   ;;  %s330_s3 = inlined_call_operand.hbm [shape: f32[16,128], index: 3, kind: output, shape index: {}]  }
   0x1   :  { %9 = vsyncpa [#allocation6], 0 }
   0x2   :  { %10 = vsyncpa [#allocation4], 0  ;;  %s240_s12 = smov [#allocation5]   ;;  %s241_s14 = smov [#allocation2]  }
   0x3   :  { %s29_s13 = sshll.u32 %s240_s12, 4  ;;  %s16_s15 = sshll.u32 %s241_s14, 4  ;;  %s30_s13 = int_to_ptr.vmem [resolvable:$true] %s29_s13  ;;  %s266_s15 = int_to_ptr.vmem [resolvable:$true] %s16_s15 }
   0x4   :  { %s146_s18 = scalar_lea.hbm %s328_s1, 16 }
   0x5   :  { %p147_p0 = scmp.ne.s32.totalorder %s328_s1, %s146_s18  ;;  %p150_p1 = scmp.lt.u32.totalorder %s146_s18, %s328_s1 }
   0x7   :  { %p152_p2 = pnand %p150_p1, %p147_p0 }
   0x9   :  { %155 = shalt.err (!%p152_p2)
}
   0xa   :  { %s156_s23 = scalar_lea.vmem %s30_s13, 16  ;;  %s160_s24 = scalar_lea.vmem %s30_s13, 32 }
   0xb   :  { %p157_p3 = scmp.ne.s32.totalorder %s30_s13, %s156_s23  ;;  %p161_p4 = scmp.lt.s32.totalorder %s30_s13, %s30_s13 }
   0xc   :  { %p162_p5 = scmp.lt.s32.totalorder %s160_s24, %s156_s23 }
   0xe   :  { %p163_p6 = por %p162_p5, %p161_p4 }
  0x10   :  { %p164_p7 = pnand %p163_p6, %p157_p3 }
  0x12   :  { %167 = shalt.err (!%p164_p7)
}
  0x13   :  { %32 = dma.hbm_to_vmem [thread:$0]  %s328_s1, 16, %s30_s13, [#allocation6]  }
  0x14   :  { %s168_s29 = scalar_lea.hbm %s327_s0, 256 }
  0x15   :  { %p169_p8 = scmp.ne.s32.totalorder %s327_s0, %s168_s29  ;;  %p172_p9 = scmp.lt.u32.totalorder %s168_s29, %s327_s0 }
  0x17   :  { %p174_p10 = pnand %p172_p9, %p169_p8 }
  0x19   :  { %177 = shalt.err (!%p174_p10)
}
  0x1a   :  { %s178_s7 = scalar_lea.vmem %s266_s15, 256  ;;  %p183_p12 = scmp.lt.s32.totalorder %s266_s15, %s266_s15 }
  0x1b   :  { %p179_p11 = scmp.ne.s32.totalorder %s266_s15, %s178_s7  ;;  %p184_p13 = scmp.lt.s32.totalorder %s178_s7, %s178_s7 }
  0x1d   :  { %p185_p0 = por %p184_p13, %p183_p12 }
  0x1f   :  { %p186_p1 = pnand %p185_p0, %p179_p11 }
  0x21   :  { %189 = shalt.err (!%p186_p1)
}
  0x22   :  { %s242_s1 = smov 128   ;;  %s243_s8 = smov 8  }
  0x23   :  { %22 = dma.hbm_to_vmem [thread:$0]  %s327_s0, 256, %s266_s15, [#allocation3], %s242_s1, %s242_s1, %s243_s8  }
  0x24   :  { %s244_s11 = smov [#allocation7]   ;;  %s190_s16 = scalar_lea.hbm %s329_s2, 16 }
  0x25   :  { %s39_s12 = sshll.u32 %s244_s11, 4  ;;  %p191_p2 = scmp.ne.s32.totalorder %s329_s2, %s190_s16  ;;  %s40_s12 = int_to_ptr.vmem [resolvable:$true] %s39_s12 }
  0x26   :  { %p194_p3 = scmp.lt.u32.totalorder %s190_s16, %s329_s2 }
  0x28   :  { %p196_p4 = pnand %p194_p3, %p191_p2 }
  0x2a   :  { %199 = shalt.err (!%p196_p4)
}
  0x2b   :  { %s200_s21 = scalar_lea.vmem %s40_s12, 16  ;;  %s204_s0 = scalar_lea.vmem %s40_s12, 32 }
  0x2c   :  { %p201_p5 = scmp.ne.s32.totalorder %s40_s12, %s200_s21  ;;  %p205_p6 = scmp.lt.s32.totalorder %s40_s12, %s40_s12 }
  0x2d   :  { %p206_p7 = scmp.lt.s32.totalorder %s204_s0, %s200_s21 }
  0x2f   :  { %p207_p8 = por %p206_p7, %p205_p6 }
  0x31   :  { %p208_p9 = pnand %p207_p8, %p201_p5 }
  0x33   :  { %211 = shalt.err (!%p208_p9)
}
  0x34   :  { %42 = dma.hbm_to_vmem [thread:$0]  %s329_s2, 16, %s40_s12, [#allocation6]  }
  0x35   :  { %234 = dma.done.wait [#allocation3], 256  }
  0x36   :  { %235 = vsyncadd [#allocation3], 4294967040 }
  0x37   :  { %236 = dma.done.wait [#allocation6], 32  }
  0x38   :  { %237 = vsyncadd [#allocation6], 4294967264  ;;  %v52_v0 = vld [vmem:[#allocation2] sm:$0xff]  ;;  %v53_v1 = vld [vmem:[#allocation2 + $0x8] sm:$0xff]  ;;  %s245_s2 = smov [#allocation8]  }
  0x39   :  { %54 = vadd.xlane.f32.xlu0 %v52_v0  ;;  %v130_v26 = vld [vmem:[#allocation5] ss:$0 sm:$0xff]  ;;  %v131_v29 = vld [vmem:[#allocation7] ss:$0 sm:$0xff]  ;;  %s117_s23 = sshll.u32 %s245_s2, 4  ;;  %s118_s23 = int_to_ptr.vmem [resolvable:$true] %s117_s23 }
  0x3a   :  { %s212_s24 = scalar_lea.vmem %s118_s23, 256  ;;  %p217_p11 = scmp.lt.s32.totalorder %s118_s23, %s118_s23 }
  0x3b   :  { %p213_p10 = scmp.ne.s32.totalorder %s118_s23, %s212_s24  ;;  %p218_p12 = scmp.lt.s32.totalorder %s212_s24, %s212_s24 }
  0x3d   :  { %56 = vadd.xlane.f32.xlu0 %v53_v1  ;;  %p219_p13 = por %p218_p12, %p217_p11 }
  0x3f   :  { %p220_p0 = pnand %p219_p13, %p213_p10 }
  0xc6   :  { %v55_v2 = vpop.xlane.xlu0 %54 }
  0xc7   :  { %v58_v3 = vmul.f32 0.0078125, %v55_v2 }
  0xc9   :  { %v60_v4 = vsub.f32 %v52_v0, %v58_v3 }
  0xca   :  { %v57_v5 = vpop.xlane.xlu0 %56 }
  0xcb   :  { %v59_v6 = vmul.f32 0.0078125, %v57_v5  ;;  %v62_v7 = vmul.f32 %v60_v4, %v60_v4 }
  0xcd   :  { %v61_v8 = vsub.f32 %v53_v1, %v59_v6  ;;  %64 = vadd.xlane.f32.xlu1 %v62_v7 }
  0xcf   :  { %v63_v9 = vmul.f32 %v61_v8, %v61_v8 }
  0xd1   :  { %66 = vadd.xlane.f32.xlu1 %v63_v9 }
 0x15a   :  { %v65_v10 = vpop.xlane.xlu1 %64 }
 0x15b   :  { %v68_v11 = vmul.f32 0.007874016, %v65_v10 }
 0x15d   :  { %138 = vrsqrt.f32 %v68_v11  ;;  %vm72_vm0 = vcmp.eq.f32.partialorder %v68_v11, inf  ;;  %v75_v16 = vand.u32 2147483648, %v68_v11  ;;  %vm74_vm1 = vcmp.eq.f32.partialorder %v68_v11, 0.0 }
 0x15e   :  { %v67_v12 = vpop.xlane.xlu1 %66 }
 0x15f   :  { %v69_v13 = vmul.f32 0.007874016, %v67_v12 }
 0x161   :  { %140 = vrsqrt.f32 %v69_v13  ;;  %vm79_vm2 = vcmp.eq.f32.partialorder %v69_v13, inf  ;;  %v82_v22 = vand.u32 2147483648, %v69_v13  ;;  %vm81_vm3 = vcmp.eq.f32.partialorder %v69_v13, 0.0 }
 0x167   :  { %v139_v14 = vpop.eup %138 }
 0x168   :  { %v71_v15 = vmul.f32 %v139_v14, %v68_v11 }
 0x16a   :  { %v73_v17 = vsel %vm72_vm0, %v68_v11, %v71_v15 }
 0x16b   :  { %v141_v18 = vpop.eup %140  ;;  %v76_v19 = vsel %vm74_vm1, %v75_v16, %v73_v17 }
 0x16c   :  { %v78_v20 = vmul.f32 %v141_v18, %v69_v13  ;;  %v84_v21 = vadd.f32 1e-06, %v76_v19 }
 0x16e   :  { %v80_v23 = vsel %vm79_vm2, %v69_v13, %v78_v20  ;;  %142 = vrcp.f32 %v84_v21 }
 0x16f   :  { %v83_v24 = vsel %vm81_vm3, %v82_v22, %v80_v23 }
 0x170   :  { %v85_v25 = vadd.f32 1e-06, %v83_v24 }
 0x172   :  { %144 = vrcp.f32 %v85_v25 }
 0x178   :  { %v143_v27 = vpop.eup %142 }
 0x179   :  { %v97_v28 = vmul.f32 %v143_v27, %v130_v26 }
 0x17b   :  { %v99_v30 = vmul.f32 %v97_v28, %v60_v4 }
 0x17c   :  { %v145_v31 = vpop.eup %144 }
 0x17d   :  { %v98_v32 = vmul.f32 %v145_v31, %v130_v26  ;;  %v108_v33 = vadd.f32 %v131_v29, %v99_v30 }
 0x17f   :  { %v100_v34 = vmul.f32 %v98_v32, %v61_v8  ;;  %110 = vst [vmem:[#allocation8] sm:$0xff] %v108_v33 }
 0x181   :  { %v109_v35 = vadd.f32 %v131_v29, %v100_v34 }
 0x183   :  { %111 = vst [vmem:[#allocation8 + $0x8] sm:$0xff] %v109_v35 }
 0x184   :  { %223 = shalt.err (!%p220_p0)
}
 0x185   :  { %s224_s27 = scalar_lea.hbm %s330_s3, 256 }
 0x186   :  { %p225_p1 = scmp.ne.s32.totalorder %s330_s3, %s224_s27  ;;  %p228_p2 = scmp.lt.u32.totalorder %s224_s27, %s330_s3 }
 0x188   :  { %p230_p3 = pnand %p228_p2, %p225_p1 }
 0x18a   :  { %233 = shalt.err (!%p230_p3)
}
 0x18b   :  { %123 = dma.vmem_to_hbm [thread:$0]  %s118_s23, 256, %s330_s3, [#allocation4], %s242_s1, %s242_s1, %s243_s8  }
 0x18c   :  { %238 = dma.done.wait [#allocation4], 256  }
 0x18d   :  { %239 = vsyncadd [#allocation4], 4294967040 }
 0x18e   :  { %127 = vsyncpa [#allocation3], 1 }
 0x18f   :  { %128 = vsyncpa [#allocation6], 1 }
 0x190   :  { %129 = vsyncpa [#allocation4], 1 }

</bundles_post_ra>
